<compile_context>
chip_gen: v7x
topology: tpu7x:2x2x1
jax: 0.10.0
libtpu: 0.0.40
codegen_flags: <defaults>
</compile_context>

<pallas_src>
import jax
import jax.numpy as jnp
from jax.experimental import pallas as pl
from jax.experimental.pallas import tpu as pltpu


def _posemb_add_kernel(x_ref, emb_ref, out_ref):
    # x_ref:   (1, 1, T) block of the flattened input
    # emb_ref: (1, T)    block of the flattened (channel-major) embedding
    # out_ref: (1, 1, T)
    out_ref[0] = x_ref[0] + emb_ref[...]


def _pick_lane_tile(L, itemsize, target_bytes, min_steps):
    """Largest multiple-of-128 divisor of L with block bytes <= target_bytes
    and at least `min_steps` grid steps.  Falls back to the full extent L
    (still correct; only non-128-multiple L pays masked stores)."""
    if L % 128 != 0:
        return L  # rare odd shapes: full-extent block is the only legal tile
    max_elems = max(128, (target_bytes // itemsize) // 128 * 128)
    start = min(L // max(min_steps, 1), max_elems)
    t = (start // 128) * 128
    while t >= 128:
        if L % t == 0:
            return t
        t -= 128
    return L


def prepare_posemb_table(emb_weight, *, height, width, dim, dtype=None):
    """One-time layout prep (do at parameter init, NOT per forward call).

    (H*W, D) table -> channel-major flat (1, D*H*W).  This is exactly
    emb.weight.view(H, W, D).permute(2, 0, 1) flattened over (C, H, W)."""
    S = height * width
    assert emb_weight.shape == (S, dim)
    if dtype is not None:
        emb_weight = emb_weight.astype(dtype)
    return emb_weight.T.reshape(1, dim * S)


def learned_pos_emb_2d(x, emb_flat, *, height, width,
                       target_block_bytes=2 << 20, donate_x=False):
    """x: (B, C, H, W) NCHW; emb_flat: (1, C*H*W) from prepare_posemb_table.
    Returns (B, C, H, W) with dtype = result_type(x, emb)."""
    B, C, H, W = x.shape
    assert (H, W) == (height, width), "spatial dims must match the embedding table"
    L = C * H * W
    assert emb_flat.shape == (1, L)

    # Mirror PyTorch broadcast-add type promotion (e.g. bf16 x + f32 param -> f32).
    out_dtype = jnp.result_type(x.dtype, emb_flat.dtype)
    x_f = x.astype(out_dtype).reshape(B, 1, L)   # free reshape (row-major NCHW)
    emb_f = emb_flat.astype(out_dtype)

    itemsize = jnp.dtype(out_dtype).itemsize
    min_steps = 2 if B == 1 else 1               # keep both v7x TCs busy
    T = _pick_lane_tile(L, itemsize, target_block_bytes, min_steps)
    ns = L // T

    block_bytes = T * itemsize
    # 3 arrays x 2 buffers per step plus headroom; within every chip's physical
    # VMEM (v7x: 64 MiB) and above v5e's 16 MiB default scoped limit.
    vmem_limit = int(min(48 << 20, max(32 << 20, 8 * block_bytes)))

    cost = pl.CostEstimate(
        flops=B * L,
        transcendentals=0,
        bytes_accessed=(2 * B * L + ns * T) * itemsize,
    )

    extra = {}
    if donate_x and x.dtype == out_dtype:
        extra["input_output_aliases"] = {0: 0}   # reuse x's HBM buffer for the output

    out = pl.pallas_call(
        _posemb_add_kernel,
        out_shape=jax.ShapeDtypeStruct((B, 1, L), out_dtype),
        grid_spec=pltpu.PrefetchScalarGridSpec(
            num_scalar_prefetch=0,
            # Batch innermost: emb block index is constant along it, so the emb
            # tile stays resident and is fetched only ns times (not ns*B).
            grid=(ns, B),
            in_specs=[
                pl.BlockSpec((1, 1, T), lambda s, b: (b, 0, s)),
                pl.BlockSpec((1, T), lambda s, b: (0, s)),
            ],
            out_specs=pl.BlockSpec((1, 1, T), lambda s, b: (b, 0, s)),
        ),
        compiler_params=pltpu.CompilerParams(
            dimension_semantics=("parallel", "parallel"),
            vmem_limit_bytes=vmem_limit,
        ),
        cost_estimate=cost,
        **extra,
    )(x_f, emb_f)

    return out.reshape(B, C, H, W)


def reference(x, emb_weight, *, height, width):
    """Pure-JAX mirror of the PyTorch forward."""
    C = x.shape[1]
    posemb = emb_weight.reshape(height, width, C).transpose(2, 0, 1)  # (C, H, W)
    return x + posemb[None, :, :, :]


if __name__ == "__main__":
    # Small config consistent with the module: height=width=16, dim=32, batch=2.
    height, width, dim = 16, 16, 32
    B = 2

    key = jax.random.PRNGKey(0)
    kx, ke = jax.random.split(key, 2)
    x = jax.random.normal(kx, (B, dim, height, width), jnp.float32)
    emb_weight = jax.random.normal(ke, (height * width, dim), jnp.float32)

    # Layout prep hoisted out of the per-call path (done once at "init" time).
    emb_flat = prepare_posemb_table(emb_weight, height=height, width=width, dim=dim)

    out = learned_pos_emb_2d(x, emb_flat, height=height, width=width)
    out = jax.block_until_ready(out)

    ref = reference(x, emb_weight, height=height, width=width)
    assert out.shape == (B, dim, height, width)
    assert out.dtype == ref.dtype
    err = float(jnp.max(jnp.abs(out - ref)))
    assert jnp.allclose(out, ref, atol=1e-6, rtol=1e-6), f"max abs err {err}"

    print("KERNEL_OK")
</pallas_src>

<mosaic_0001>
module attributes {stable_mosaic.version = 11 : i64} {
  func.func @_posemb_add_kernel(%arg0: i32, %arg1: i32, %arg2: memref<1x1x8192xf32, #tpu.memory_space<vmem>>, %arg3: memref<1x8192xf32, #tpu.memory_space<vmem>>, %arg4: memref<1x1x8192xf32, #tpu.memory_space<vmem>>) attributes {dimension_semantics = [#tpu.dimension_semantics<parallel>, #tpu.dimension_semantics<parallel>], iteration_bounds = array<i64: 1, 2>, scalar_prefetch = 0 : i64, scratch_operands = 0 : i64, tpu.core_type = #tpu.core_type<tc>, window_params = [{transform_indices = @transform_0, window_bounds = array<i64: 1, 1, 8192>}, {transform_indices = @transform_1, window_bounds = array<i64: 1, 8192>}, {transform_indices = @transform_2, window_bounds = array<i64: 1, 1, 8192>}]} {
    %c0 = arith.constant 0 : index
    %c0_0 = arith.constant 0 : index
    %c0_1 = arith.constant 0 : index
    %0 = vector.load %arg2[%c0, %c0_0, %c0_1] : memref<1x1x8192xf32, #tpu.memory_space<vmem>>, vector<1x1x8192xf32>
    %1 = vector.shape_cast %0 : vector<1x1x8192xf32> to vector<1x8192xf32>
    %c0_2 = arith.constant 0 : index
    %c0_3 = arith.constant 0 : index
    %2 = vector.load %arg3[%c0_2, %c0_3] : memref<1x8192xf32, #tpu.memory_space<vmem>>, vector<1x8192xf32>
    %3 = arith.addf %1, %2 : vector<1x8192xf32>
    %c0_4 = arith.constant 0 : index
    %c0_5 = arith.constant 0 : index
    %c0_6 = arith.constant 0 : index
    %4 = vector.load %arg4[%c0_4, %c0_5, %c0_6] : memref<1x1x8192xf32, #tpu.memory_space<vmem>>, vector<1x1x8192xf32>
    %5 = vector.shape_cast %4 : vector<1x1x8192xf32> to vector<1x8192xf32>
    %6 = vector.shape_cast %3 : vector<1x8192xf32> to vector<1x1x8192xf32>
    tpu.vector_store %arg4[%c0_4, %c0_5, %c0_6], %6 {strides = array<i32>} : memref<1x1x8192xf32, #tpu.memory_space<vmem>>, vector<1x1x8192xf32>,
    return
  }
  func.func @transform_0(%arg0: i32, %arg1: i32) -> (i32, i32, i32) {
    %c0_i32 = arith.constant 0 : i32
    %c0_i32_0 = arith.constant 0 : i32
    return %arg1, %c0_i32, %arg0 : i32, i32, i32
  }
  func.func @transform_1(%arg0: i32, %arg1: i32) -> (i32, i32) {
    %c0_i32 = arith.constant 0 : i32
    %c0_i32_0 = arith.constant 0 : i32
    return %c0_i32, %arg0 : i32, i32
  }
  func.func @transform_2(%arg0: i32, %arg1: i32) -> (i32, i32, i32) {
    %c0_i32 = arith.constant 0 : i32
    %c0_i32_0 = arith.constant 0 : i32
    return %arg1, %c0_i32, %arg0 : i32, i32, i32
  }
}

</mosaic_0001>

<bundles_post_ra>
// kernel: tpu_custom_call.1
= control target key start
LH: loop header
LB: loop body
LE: loop exit
PB: predicated region body
PF: predicated region fallthrough
CT: control target
= control target key end

     0   :  { %7 = vsyncpa [#allocation3], 0  ;;  %s829_s0 = inlined_call_operand.hbm [shape: f32[2,1,8192], index: 0, kind: input, shape index: {}]   ;;  %s830_s1 = inlined_call_operand.hbm [shape: f32[1,8192], index: 1, kind: input, shape index: {}]   ;;  %s831_s2 = inlined_call_operand.hbm [shape: f32[2,1,8192], index: 2, kind: output, shape index: {}]  }
   0x1   :  { %9 = vsyncpa [#allocation3 + $0x1], 0 }
   0x2   :  { %10 = vsyncpa [#allocation6], 0 }
   0x3   :  { %11 = vsyncpa [#allocation4], 0 }
   0x4   :  { %13 = vsyncpa [#allocation4 + $0x1], 0  ;;  %s603_s9 = smov 0   ;;  %s605_s10 = smov 0  }
   0x5   :  { %s607_s11 = smov 0   ;;  %s609_s12 = smov 0  }
   0x6   :  { %s611_s13 = smov 0   ;;  %s613_s14 = smov 0  }
   0x7 LB: > { %s347_s15 = sadd.s32 4294967295, %s583_s14   ;;  %s348_s16 = sadd.s32 4294967294, %s583_s14   ;;  %s583_s14 = sphi %s613_s14, %s19_s14   ;;  %s579_s13 = sphi %s611_s13, %s856_s13   ;;  %s575_s12 = sphi %s609_s12, %s855_s12   ;;  %s571_s11 = sphi %s607_s11, %s854_s11   ;;  %s567_s10 = sphi %s605_s10, %s853_s10   ;;  %s563_s9 = sphi %s603_s9, %s852_s9  }
   0x8   : > { %p53_p0 = scmp.ne.s32.totalorder %s567_s10, %s563_s9  ;;  %p637_p1 = scmp.eq.s32.totalorder %s347_s15, 0 }
   0x9   : > { %p641_p2 = scmp.eq.s32.totalorder %s347_s15, 1  ;;  %p111_p3 = scmp.eq.s32.totalorder %s348_s16, 1 }
   0xa   : > { %s836_s17 = scalar_select %p637_p1, 1, 0 }
   0xb   : > { %s837_s18 = scalar_select %p641_p2, 1, 0 }
   0xc   : > { %p647_p4 = por %p637_p1, %p53_p0  ;;  %p349_p5 = scmp.ge.s32.totalorder %s583_s14, 1 }
   0xd   : > { %p652_p6 = por %p111_p3, %p53_p0  ;;  %p118_p7 = scmp.lt.s32.totalorder %s583_s14, 3 }
   0xe   : > { %s838_s19 = scalar_select %p647_p4, 1, 0 }
   0xf   : > { %s839_s20 = scalar_select %p652_p6, 1, 0 }
  0x10   : > { %p657_p8 = pnand %p349_p5, %p118_p7  ;;  %s585_s22 = smov [#allocation5]  }
  0x11   : > { %s134_s23 = sshll.u32 %s585_s22, 4  ;;  %s28_s25 = sadd.s32 1, %s579_s13  ;;  %s135_s23 = int_to_ptr.vmem [resolvable:$true] %s134_s23 }
  0x12   : > { %s840_s21 = scalar_select %p657_p8, 1, 0 }
  0x13   : > { %p374_p10 = pneg %p657_p8  ;;  %s40_s26 = sadd.s32 1, %s571_s11 }
  0x14   : > { %p672_p12 = scmp.ge.s32.totalorder %s28_s25, 2  ;;  %s439_s30 = scalar_lea.hbm %s830_s1, 1024 }
  0x15   : > { %p666_p11 = pnand %p374_p10, %p637_p1  ;;  %p440_p13 = scmp.ne.s32.totalorder %s830_s1, %s439_s30 }
  0x16   : > { %s842_s27 = scalar_select %p672_p12, 1, 0 }
  0x17   : > { %p441_p0 = pneg %p666_p11  ;;  %p446_p7 = scmp.lt.u32.totalorder %s439_s30, %s830_s1 }
  0x19   : > { %p442_p3 = pnand %p441_p0, %p440_p13 }
  0x1b   : > { %p443_p5 = pneg %p442_p3 }
  0x1d   : > { %p448_p10 = pnand %p446_p7, %p443_p5 }
  0x1f   : > { %451 = shalt.err (!%p448_p10)
}
  0x20   : > { %s452_s7 = scalar_lea.vmem %s135_s23, 1024  ;;  %p460_p4 = scmp.lt.s32.totalorder %s135_s23, %s135_s23 }
  0x21   : > { %p453_p9 = scmp.ne.s32.totalorder %s135_s23, %s452_s7  ;;  %p461_p8 = scmp.lt.s32.totalorder %s452_s7, %s452_s7 }
  0x23   : > { %p455_p6 = pnand %p453_p9, %p441_p0  ;;  %p462_p2 = por %p461_p8, %p460_p4 }
  0x25   : > { %p456_p1 = pneg %p455_p6 }
  0x27   : > { %p463_p12 = pnand %p462_p2, %p456_p1 }
  0x29   : > { %466 = shalt.err (!%p463_p12)
}
  0x2a   : > { %377 = dma.hbm_to_vmem [thread:$0]  (!%p666_p11), %s830_s1, 1024, %s135_s23, [#allocation6]  }
  0x2b   : > { %p843_p4 = scmp.ne.s32.totalorder %s842_s27, 0  ;;  %p47_p1 = scmp.ne.s32.totalorder %s571_s11, %s567_s10 }
  0x2c   : > { %p48_p2 = scmp.eq.s32.totalorder %s583_s14, 0  ;;  %p387_p6 = scmp.lt.s32.totalorder %s583_s14, 2 }
  0x2d   : > { %s858_s25 = smov (%p843_p4, %s28_s25), 0  ;;  %p844_p12 = scmp.ne.s32.totalorder %s837_s18, 0 }
  0x2e   : > { %s35_s16 = ssub.s32 %s579_s13, %s858_s25  ;;  %p49_p9 = por %p48_p2, %p47_p1 }
  0x2f   : > { %p38_p8 = scmp.eq.s32.totalorder %s35_s16, 0  ;;  %p704_p13 = por %p844_p12, %p47_p1 }
  0x30   : > { %s145_s24 = sand.u32 1, %s571_s11   ;;  %s364_s27 = sshll.u32 %s579_s13, 10 }
  0x31   : > { %s712_s28 = scalar_select %p38_p8, %s571_s11, %s40_s26  }
  0x32   : > { %s352_s23 = sshll.u32 %s145_s24, 6  ;;  %s718_s3 = scalar_lea.hbm %s829_s0, %s364_s27 }
  0x33   : > { %s149_s18 = scalar_lea.vmem [#allocation2], %s352_s23  ;;  %p722_p11 = pnand %p387_p6, %p49_p9 }
  0x34   : > { %s159_s4 = sshll.u32 %s149_s18, 4  ;;  %s146_s26 = scalar_lea.sflag [#allocation3], %s145_s24  ;;  %s720_s4 = int_to_ptr.vmem [resolvable:$true] %s159_s4 }
  0x35   : > { %s467_s6 = scalar_lea.hbm %s718_s3, 1024  ;;  %p469_p3 = pneg %p722_p11 }
  0x36   : > { %p468_p0 = scmp.ne.s32.totalorder %s718_s3, %s467_s6  ;;  %s472_s15 = scalar_lea.hbm %s829_s0, 2048 }
  0x37   : > { %p473_p10 = scmp.lt.u32.totalorder %s718_s3, %s829_s0  ;;  %p474_p4 = scmp.lt.u32.totalorder %s472_s15, %s467_s6 }
  0x38   : > { %p470_p5 = pnand %p469_p3, %p468_p0  ;;  %p476_p2 = scmp.lt.u32.totalorder %s467_s6, %s718_s3 }
  0x39   : > { %p475_p1 = por %p474_p4, %p473_p10 }
  0x3a   : > { %p471_p7 = pneg %p470_p5 }
  0x3b   : > { %p477_p6 = por %p476_p2, %p475_p1 }
  0x3d   : > { %p478_p8 = pnand %p477_p6, %p471_p7 }
  0x3f   : > { %481 = shalt.err (!%p478_p8)
}
  0x40   : > { %s482_s24 = scalar_lea.vmem %s720_s4, 1024  ;;  %s586_s27 = smov [#allocation2]  }
  0x41   : > { %p483_p9 = scmp.ne.s32.totalorder %s720_s4, %s482_s24  ;;  %s487_s29 = sshll.u32 %s586_s27, 4  ;;  %s488_s29 = int_to_ptr.vmem [resolvable:$false] %s487_s29 }
  0x42   : > { %s489_s30 = scalar_lea.vmem %s488_s29, 2048  ;;  %p490_p5 = scmp.lt.s32.totalorder %s720_s4, %s488_s29 }
  0x43   : > { %p485_p12 = pnand %p483_p9, %p469_p3  ;;  %p491_p10 = scmp.lt.s32.totalorder %s489_s30, %s482_s24 }
  0x45   : > { %p486_p0 = pneg %p485_p12  ;;  %p492_p4 = por %p491_p10, %p490_p5 }
  0x47   : > { %p493_p1 = pnand %p492_p4, %p486_p0 }
  0x49   : > { %496 = shalt.err (!%p493_p1)
}
  0x4a   : > { %381 = dma.hbm_to_vmem [thread:$0]  (!%p722_p11), %s718_s3, 1024, %s720_s4, %s146_s26  }
  0x4b   : > { %p847_p7 = scmp.ne.s32.totalorder %s840_s21, 0 }
  0x4c   : > { %s754_s18 = sand.u32 (!%p847_p7), 1, %s567_s10   ;;  %p848_p3 = scmp.ne.s32.totalorder (!%p847_p7), %s838_s19, 0 }
  0x4d   : > { %168 = sbr.rel (%p847_p7) target bundleno = 113 (0x71), region = 28  ;;  %s356_s6 = sshll.u32 (!%p847_p7), %s754_s18, 6 }
  0x4e   : > { %s171_s7 = scalar_lea.sflag (!%p847_p7), [#allocation3], %s754_s18  ;;  %s758_s8 = scalar_lea.vmem (!%p847_p7), [#allocation2], %s356_s6 }
  0x54   : > { %550 = dma.done.wait (%p848_p3), %s171_s7, 1024  }
  0x55   : > { %552 = vsyncadd (%p848_p3), %s171_s7, 4294966272  ;;  %p849_p11 = scmp.ne.s32.totalorder %s836_s17, 0 }
  0x57   : > { %554 = dma.done.wait (%p849_p11), [#allocation6], 1024  }
  0x58   : > { %556 = vsyncadd (%p849_p11), [#allocation6], 4294966272  ;;  %v202_v0 = vld [vmem:[%s758_s8] sm:$0xff]  ;;  %v203_v2 = vld [vmem:[%s758_s8 + $0x8] sm:$0xff]  ;;  %s198_s17 = scalar_lea.vmem [#allocation7], %s356_s6  ;;  %s365_s19 = sshll.u32 %s575_s12, 10 }
  0x59   : > { %v210_v1 = vld [vmem:[#allocation5] sm:$0xff]  ;;  %v211_v4 = vld [vmem:[#allocation5 + $0x8] sm:$0xff]  ;;  %v204_v5 = vld [vmem:[%s758_s8 + $0x10] sm:$0xff]  ;;  %s251_s21 = sshll.u32 %s198_s17, 4  ;;  %s780_s12 = scalar_lea.hbm %s831_s2, %s365_s19  ;;  %s782_s21 = int_to_ptr.vmem [resolvable:$true] %s251_s21 }
  0x5a   : > { %v218_v3 = vadd.f32 %v210_v1, %v202_v0  ;;  %v212_v6 = vld [vmem:[#allocation5 + $0x10] sm:$0xff]  ;;  %v219_v7 = vadd.f32 %v211_v4, %v203_v2  ;;  %v205_v9 = vld [vmem:[%s758_s8 + $0x18] sm:$0xff]  ;;  %v206_v11 = vld [vmem:[%s758_s8 + $0x20] sm:$0xff]  ;;  %s235_s5 = scalar_lea.sflag [#allocation4], %s754_s18  ;;  %s497_s26 = scalar_lea.vmem %s782_s21, 1024 }
  0x5b   : > { %v220_v8 = vadd.f32 %v212_v6, %v204_v5  ;;  %v213_v10 = vld [vmem:[#allocation5 + $0x18] sm:$0xff]  ;;  %v214_v13 = vld [vmem:[#allocation5 + $0x20] sm:$0xff]  ;;  %v207_v14 = vld [vmem:[%s758_s8 + $0x28] sm:$0xff]  ;;  %p498_p2 = scmp.ne.s32.totalorder %s782_s21, %s497_s26  ;;  %s587_s15 = smov [#allocation7]  }
  0x5c   : > { %226 = vst [vmem:[%s198_s17] sm:$0xff] %v218_v3  ;;  %v221_v12 = vadd.f32 %v213_v10, %v205_v9  ;;  %v215_v15 = vld [vmem:[#allocation5 + $0x28] sm:$0xff]  ;;  %227 = vst [vmem:[%s198_s17 + $0x8] sm:$0xff] %v219_v7  ;;  %v222_v16 = vadd.f32 %v214_v13, %v206_v11  ;;  %v208_v18 = vld [vmem:[%s758_s8 + $0x30] sm:$0xff]  ;;  %s501_s16 = sshll.u32 %s587_s15, 4  ;;  %s502_s16 = int_to_ptr.vmem [resolvable:$false] %s501_s16 }
  0x5d   : > { %228 = vst [vmem:[%s198_s17 + $0x10] sm:$0xff] %v220_v8  ;;  %v223_v17 = vadd.f32 %v215_v15, %v207_v14  ;;  %v216_v19 = vld [vmem:[#allocation5 + $0x30] sm:$0xff]  ;;  %v209_v20 = vld [vmem:[%s758_s8 + $0x38] sm:$0xff]  ;;  %p499_p6 = pnand %p498_p2, %p704_p13  ;;  %s503_s23 = scalar_lea.vmem %s502_s16, 2048 }
  0x5e   : > { %229 = vst [vmem:[%s198_s17 + $0x18] sm:$0xff] %v221_v12  ;;  %v224_v21 = vadd.f32 %v216_v19, %v208_v18  ;;  %v217_v22 = vld [vmem:[#allocation5 + $0x38] sm:$0xff]  ;;  %230 = vst [vmem:[%s198_s17 + $0x20] sm:$0xff] %v222_v16  ;;  %p504_p9 = scmp.lt.s32.totalorder %s782_s21, %s502_s16  ;;  %p505_p12 = scmp.lt.s32.totalorder %s503_s23, %s497_s26 }
  0x5f   : > { %231 = vst [vmem:[%s198_s17 + $0x28] sm:$0xff] %v223_v17  ;;  %v225_v23 = vadd.f32 %v217_v22, %v209_v20  ;;  %p500_p8 = pneg %p499_p6 }
  0x60   : > { %232 = vst [vmem:[%s198_s17 + $0x30] sm:$0xff] %v224_v21  ;;  %p506_p0 = por %p505_p12, %p504_p9 }
  0x61   : > { %233 = vst [vmem:[%s198_s17 + $0x38] sm:$0xff] %v225_v23 }
  0x62   : > { %p507_p5 = pnand %p506_p0, %p500_p8 }
  0x64   : > { %510 = shalt.err (!%p507_p5)
}
  0x65   : > { %s511_s24 = scalar_lea.hbm %s780_s12, 1024  ;;  %s515_s30 = scalar_lea.hbm %s831_s2, 2048 }
  0x66   : > { %p512_p10 = scmp.ne.s32.totalorder %s780_s12, %s511_s24  ;;  %p516_p7 = scmp.lt.u32.totalorder %s780_s12, %s831_s2 }
  0x67   : > { %p517_p3 = scmp.lt.u32.totalorder %s515_s30, %s511_s24  ;;  %p519_p2 = scmp.lt.u32.totalorder %s511_s24, %s780_s12 }
  0x68   : > { %p513_p4 = pnand %p512_p10, %p704_p13 }
  0x69   : > { %p518_p11 = por %p517_p3, %p516_p7 }
  0x6a   : > { %p514_p1 = pneg %p513_p4 }
  0x6b   : > { %p520_p6 = por %p519_p2, %p518_p11 }
  0x6d   : > { %p521_p8 = pnand %p520_p6, %p514_p1 }
  0x6f   : > { %524 = shalt.err (!%p521_p8)
}
  0x70   : > { %372 = dma.vmem_to_hbm [thread:$0]  (%p704_p13), %s782_s21, 1024, %s780_s12, %s235_s5  }
  0x71 PF: > { %s263_s7 = sand.u32 1, %s563_s9   ;;  %p850_p9 = scmp.ne.s32.totalorder %s839_s20, 0 }
  0x72   : > { %p851_p12 = scmp.ge.s32.totalorder %s583_s14, 2  ;;  %s264_s8 = scalar_lea.sflag [#allocation4], %s263_s7 }
  0x74   : > { %p383_p0 = pnand %p851_p12, %p850_p9 }
  0x76   : > { %558 = dma.done.wait (!%p383_p0), %s264_s8, 1024  }
  0x77   : > { %560 = vsyncadd (!%p383_p0), %s264_s8, 4294966272  ;;  %s19_s14 = sadd.s32 1, %s583_s14   ;;  %s852_s9 = smov %s567_s10 }
  0x78   : > { %p16_p5 = scmp.ge.s32.totalorder %s19_s14, 4   ;;  %s853_s10 = smov %s571_s11 }
  0x79   : > { %s854_s11 = smov %s712_s28  ;;  %s855_s12 = smov %s579_s13 }
  0x7a   : > { %s856_s13 = smov %s858_s25  ;;  %18 = sbr.rel (!%p16_p5) target bundleno = 7 (0x7), region = 78 }
  0x81   :  { %269 = vsyncpa [#allocation3], 1 }
  0x82   :  { %271 = vsyncpa [#allocation3 + $0x1], 1 }
  0x83   :  { %272 = vsyncpa [#allocation6], 1 }
  0x84   :  { %273 = vsyncpa [#allocation4], 1 }
  0x85   :  { %275 = vsyncpa [#allocation4 + $0x1], 1 }

</bundles_post_ra>
